<compile_context>
chip_gen: v6e
topology: v6e:2x2x1
jax: 0.10.0
libtpu: 0.0.40
codegen_flags: <defaults>
</compile_context>

<pallas_src>
import functools

import jax
import jax.numpy as jnp
from jax.experimental import pallas as pl
from jax.experimental.pallas import tpu as pltpu

_LANE = 128
_SUBLANE = 8


def _round_up(x, m):
    return ((x + m - 1) // m) * m


def linear_qn_kernel(x_ref, w1_ref, b1_ref, w2_ref, b2_ref, o_ref):
    # fc1: (TB, IN) @ (IN, HID) -> f32 accumulate; bias + ReLU in f32 (VPU).
    h = jnp.dot(x_ref[...], w1_ref[...], preferred_element_type=jnp.float32)
    h = jnp.maximum(h + b1_ref[...], 0.0)
    # fc2: (TB, HID) @ (HID, OUT_PAD) -> f32 accumulate; bias in f32.
    y = jnp.dot(h.astype(jnp.bfloat16), w2_ref[...],
                preferred_element_type=jnp.float32)
    y = y + b2_ref[...]
    o_ref[...] = y.astype(o_ref.dtype)


@functools.partial(jax.jit, static_argnames=("tb",))
def linear_qn_forward(x, w1, b1, w2, b2, *, tb=None):
    """x: (B, IN); w1: (IN, HID); b1: (1, HID); w2: (HID, OUT); b2: (1, OUT)."""
    B, IN = x.shape
    HID = w1.shape[1]
    OUT = w2.shape[1]
    OUT_PAD = _round_up(OUT, _LANE)          # lane-dense output slab

    # Batch tile: multiple of the sublane (8), capped so VMEM stays small even
    # on v7x's 64 MiB (weights + double-buffered x/out tiles + hidden tile).
    if tb is None:
        tb = min(512, _round_up(B, _SUBLANE))
    B_pad = _round_up(B, tb)

    # bf16 MXU operands: halves the per-tile x DMA bytes and resident weight
    # bytes; accumulation stays f32 inside the kernel.
    x_b = x.astype(jnp.bfloat16)
    if B_pad != B:
        x_b = jnp.pad(x_b, ((0, B_pad - B), (0, 0)))
    w1_b = w1.astype(jnp.bfloat16)
    w2_b = jnp.pad(w2, ((0, 0), (0, OUT_PAD - OUT))).astype(jnp.bfloat16)
    b1_f = b1.astype(jnp.float32)
    b2_f = jnp.pad(b2, ((0, 0), (0, OUT_PAD - OUT))).astype(jnp.float32)

    grid = (B_pad // tb,)

    flops = 2 * B_pad * IN * HID + 2 * B_pad * HID * OUT_PAD
    bytes_accessed = (
        x_b.size * 2
        + w1_b.size * 2 + w2_b.size * 2
        + b1_f.size * 4 + b2_f.size * 4
        + B_pad * OUT_PAD * x.dtype.itemsize
    )

    y_pad = pl.pallas_call(
        linear_qn_kernel,
        out_shape=jax.ShapeDtypeStruct((B_pad, OUT_PAD), x.dtype),
        grid=grid,
        in_specs=[
            pl.BlockSpec((tb, IN), lambda i: (i, 0)),        # x: tiled over batch
            pl.BlockSpec((IN, HID), lambda i: (0, 0)),       # w1: VMEM-resident
            pl.BlockSpec((1, HID), lambda i: (0, 0)),        # b1: VMEM-resident
            pl.BlockSpec((HID, OUT_PAD), lambda i: (0, 0)),  # w2: VMEM-resident
            pl.BlockSpec((1, OUT_PAD), lambda i: (0, 0)),    # b2: VMEM-resident
        ],
        out_specs=pl.BlockSpec((tb, OUT_PAD), lambda i: (i, 0)),
        compiler_params=pltpu.CompilerParams(
            dimension_semantics=("parallel",)),              # megacore on v7x
        cost_estimate=pl.CostEstimate(
            flops=flops, transcendentals=0, bytes_accessed=bytes_accessed),
    )(x_b, w1_b, b1_f, w2_b, b2_f)

    return y_pad[:B, :OUT]


def init_linear_qn_params(key, input_layer, hidden_layer, output_layer,
                          dtype=jnp.float32):
    """Deterministic init matching nn.Linear's U(-1/sqrt(fan_in), 1/sqrt(fan_in))."""
    k1, k2, k3, k4 = jax.random.split(key, 4)
    bound1 = 1.0 / (input_layer ** 0.5)
    bound2 = 1.0 / (hidden_layer ** 0.5)
    # stored as (in, out) = transpose of torch's (out, in) weight layout
    w1 = jax.random.uniform(k1, (input_layer, hidden_layer), dtype,
                            minval=-bound1, maxval=bound1)
    b1 = jax.random.uniform(k2, (1, hidden_layer), dtype,
                            minval=-bound1, maxval=bound1)
    w2 = jax.random.uniform(k3, (hidden_layer, output_layer), dtype,
                            minval=-bound2, maxval=bound2)
    b2 = jax.random.uniform(k4, (1, output_layer), dtype,
                            minval=-bound2, maxval=bound2)
    return w1, b1, w2, b2


if __name__ == "__main__":
    # Small, forward-consistent shapes: batch=8, input=32, hidden=64, output=16
    B, IN, HID, OUT = 8, 32, 64, 16

    key = jax.random.PRNGKey(0)
    kx, kp = jax.random.split(key)
    x = jax.random.normal(kx, (B, IN), jnp.float32)
    w1, b1, w2, b2 = init_linear_qn_params(kp, IN, HID, OUT)

    y = linear_qn_forward(x, w1, b1, w2, b2)
    y = jax.block_until_ready(y)
    assert y.shape == (B, OUT)
    assert y.dtype == x.dtype

    # Reference matching the kernel's numerics (bf16 MXU inputs, f32 accumulate).
    h_ref = jnp.maximum(
        jnp.dot(x.astype(jnp.bfloat16), w1.astype(jnp.bfloat16),
                preferred_element_type=jnp.float32) + b1, 0.0)
    ref_bf = jnp.dot(h_ref.astype(jnp.bfloat16), w2.astype(jnp.bfloat16),
                     preferred_element_type=jnp.float32) + b2
    assert jnp.allclose(y, ref_bf, atol=1e-3, rtol=1e-3)

    # Loose sanity check against the full-f32 PyTorch-equivalent forward.
    ref_f32 = jnp.maximum(x @ w1 + b1, 0.0) @ w2 + b2
    assert jnp.allclose(y, ref_f32, atol=1e-1, rtol=1e-1)

    print("KERNEL_OK")
</pallas_src>

<mosaic_0001>
module attributes {stable_mosaic.version = 11 : i64} {
  func.func @linear_qn_kernel(%arg0: i32, %arg1: memref<8x32xbf16, #tpu.memory_space<vmem>>, %arg2: memref<32x64xbf16, #tpu.memory_space<vmem>>, %arg3: memref<1x64xf32, #tpu.memory_space<vmem>>, %arg4: memref<64x128xbf16, #tpu.memory_space<vmem>>, %arg5: memref<1x128xf32, #tpu.memory_space<vmem>>, %arg6: memref<8x128xf32, #tpu.memory_space<vmem>>) attributes {dimension_semantics = [#tpu.dimension_semantics<parallel>], iteration_bounds = array<i64: 1>, scalar_prefetch = 0 : i64, scratch_operands = 0 : i64, tpu.core_type = #tpu.core_type<tc>, window_params = [{transform_indices = @transform_0, window_bounds = array<i64: 8, 32>}, {pipeline_mode = #tpu.pipeline_mode<synchronous>, transform_indices = @transform_1, window_bounds = array<i64: 32, 64>}, {pipeline_mode = #tpu.pipeline_mode<synchronous>, transform_indices = @transform_2, window_bounds = array<i64: 1, 64>}, {pipeline_mode = #tpu.pipeline_mode<synchronous>, transform_indices = @transform_3, window_bounds = array<i64: 64, 128>}, {pipeline_mode = #tpu.pipeline_mode<synchronous>, transform_indices = @transform_4, window_bounds = array<i64: 1, 128>}, {transform_indices = @transform_5, window_bounds = array<i64: 8, 128>}]} {
    %c0 = arith.constant 0 : index
    %c0_0 = arith.constant 0 : index
    %0 = vector.load %arg1[%c0, %c0_0] : memref<8x32xbf16, #tpu.memory_space<vmem>>, vector<8x32xbf16>
    %c0_1 = arith.constant 0 : index
    %c0_2 = arith.constant 0 : index
    %1 = vector.load %arg2[%c0_1, %c0_2] : memref<32x64xbf16, #tpu.memory_space<vmem>>, vector<32x64xbf16>
    %cst = arith.constant dense<0.000000e+00> : vector<8x64xf32>
    %2 = tpu.matmul %0, %1, %cst {dimension_numbers = #tpu.dot_dimension_numbers<[1], [0], [0], [1], [0, 0, 1, 1], [], []>} : vector<8x32xbf16>, vector<32x64xbf16>, vector<8x64xf32> -> vector<8x64xf32>
    %c0_3 = arith.constant 0 : index
    %c0_4 = arith.constant 0 : index
    %3 = vector.load %arg3[%c0_3, %c0_4] : memref<1x64xf32, #tpu.memory_space<vmem>>, vector<1x64xf32>
    %4 = vector.broadcast %3 : vector<1x64xf32> to vector<8x64xf32>
    %5 = arith.addf %2, %4 : vector<8x64xf32>
    %cst_5 = arith.constant 0.000000e+00 : f32
    %6 = vector.broadcast %cst_5 : f32 to vector<8x64xf32>
    %7 = arith.maximumf %5, %6 : vector<8x64xf32>
    %8 = arith.truncf %7 : vector<8x64xf32> to vector<8x64xbf16>
    %c0_6 = arith.constant 0 : index
    %c0_7 = arith.constant 0 : index
    %9 = vector.load %arg4[%c0_6, %c0_7] : memref<64x128xbf16, #tpu.memory_space<vmem>>, vector<64x128xbf16>
    %cst_8 = arith.constant dense<0.000000e+00> : vector<8x128xf32>
    %10 = tpu.matmul %8, %9, %cst_8 {dimension_numbers = #tpu.dot_dimension_numbers<[1], [0], [0], [1], [0, 0, 1, 1], [], []>} : vector<8x64xbf16>, vector<64x128xbf16>, vector<8x128xf32> -> vector<8x128xf32>
    %c0_9 = arith.constant 0 : index
    %c0_10 = arith.constant 0 : index
    %11 = vector.load %arg5[%c0_9, %c0_10] : memref<1x128xf32, #tpu.memory_space<vmem>>, vector<1x128xf32>
    %12 = vector.broadcast %11 : vector<1x128xf32> to vector<8x128xf32>
    %13 = arith.addf %10, %12 : vector<8x128xf32>
    %c0_11 = arith.constant 0 : index
    %c0_12 = arith.constant 0 : index
    %14 = vector.load %arg6[%c0_11, %c0_12] : memref<8x128xf32, #tpu.memory_space<vmem>>, vector<8x128xf32>
    tpu.vector_store %arg6[%c0_11, %c0_12], %13 {strides = array<i32>} : memref<8x128xf32, #tpu.memory_space<vmem>>, vector<8x128xf32>,
    return
  }
  func.func @transform_0(%arg0: i32) -> (i32, i32) {
    %c0_i32 = arith.constant 0 : i32
    %c0_i32_0 = arith.constant 0 : i32
    return %arg0, %c0_i32 : i32, i32
  }
  func.func @transform_1(%arg0: i32) -> (i32, i32) {
    %c0_i32 = arith.constant 0 : i32
    %c0_i32_0 = arith.constant 0 : i32
    %c0_i32_1 = arith.constant 0 : i32
    return %c0_i32, %c0_i32_0 : i32, i32
  }
  func.func @transform_2(%arg0: i32) -> (i32, i32) {
    %c0_i32 = arith.constant 0 : i32
    %c0_i32_0 = arith.constant 0 : i32
    %c0_i32_1 = arith.constant 0 : i32
    return %c0_i32, %c0_i32_0 : i32, i32
  }
  func.func @transform_3(%arg0: i32) -> (i32, i32) {
    %c0_i32 = arith.constant 0 : i32
    %c0_i32_0 = arith.constant 0 : i32
    %c0_i32_1 = arith.constant 0 : i32
    return %c0_i32, %c0_i32_0 : i32, i32
  }
  func.func @transform_4(%arg0: i32) -> (i32, i32) {
    %c0_i32 = arith.constant 0 : i32
    %c0_i32_0 = arith.constant 0 : i32
    %c0_i32_1 = arith.constant 0 : i32
    return %c0_i32, %c0_i32_0 : i32, i32
  }
  func.func @transform_5(%arg0: i32) -> (i32, i32) {
    %c0_i32 = arith.constant 0 : i32
    %c0_i32_0 = arith.constant 0 : i32
    return %arg0, %c0_i32 : i32, i32
  }
}

</mosaic_0001>

<bundles_post_ra>
// kernel: linear_qn_forward.1
= control target key start
LH: loop header
LB: loop body
LE: loop exit
PB: predicated region body
PF: predicated region fallthrough
CT: control target
= control target key end

     0   :  { %v259_v1 = vmov 0.0   ;;  %vm260_vm0 = vmmov 0   ;;  %vm46_vm1 = vcmask 261120   ;;  %s322_s0 = inlined_call_operand.vmem [shape: bf16[8,32], index: 0, kind: input, shape index: {}]   ;;  %s323_s1 = inlined_call_operand.vmem [shape: bf16[32,64], index: 1, kind: input, shape index: {}]   ;;  %s324_s2 = inlined_call_operand.vmem [shape: f32[1,64], index: 2, kind: input, shape index: {}]   ;;  %s325_s3 = inlined_call_operand.vmem [shape: bf16[64,128], index: 3, kind: input, shape index: {}]   ;;  %s326_s4 = inlined_call_operand.vmem [shape: f32[1,128], index: 4, kind: input, shape index: {}]   ;;  %s327_s5 = inlined_call_operand.hbm [shape: f32[8,128], index: 5, kind: output, shape index: {}]  }
   0x1   :  { %v231_v0 = vld [vmem:[%s323_s1 + $0x8] sm:$0xff]   ;;  %208 = vmatprep.subr.bf16.mxu0 %v259_v1  ;;  %216 = vmatprep.subr.bf16.mxu1 %v259_v1  ;;  %v232_v2 = vld [vmem:[%s323_s1] sm:$0xff]   ;;  %v233_v3 = vld [vmem:[%s325_s3 + $0x18] sm:$0xff]  }
   0x2   :  { %209 = vmatpush3.bf16.msra.mxu0 %v231_v0  ;;  %212 = vmatprep.mubr.msk.bf16.mxu0 %vm260_vm0, %v259_v1  ;;  %v234_v4 = vld [vmem:[%s325_s3 + $0x10] sm:$0xff]   ;;  %v22_v5 = vld [vmem:[%s322_s0] sm:$0xf] }
   0x3   :  { %210 = vmatprep.subr.bf16.mxu0 %v259_v1  ;;  %224 = vmatprep.mubr.msk.bf16.mxu1 %vm260_vm0, %v259_v1 }
   0x4   :  { %217 = vmatpush3.bf16.msra.mxu1 %v233_v3 }
   0x5   :  { %218 = vmatprep.subr.bf16.mxu1 %v259_v1 }
   0x6   :  { %211 = vmatpush3.bf16.msra.mxu0 %v232_v2 }
   0x7   :  { %10 = vsyncpa [#allocation3], 0  ;;  %v235_v6 = vld [vmem:[%s325_s3 + $0x8] sm:$0xff]   ;;  %v236_v7 = vld [vmem:[%s325_s3] sm:$0xff]   ;;  %vm131_vm2 = vcmask 523264   ;;  %s261_s9 = smov [#allocation2]  }
   0x8   :  { %219 = vmatpush3.bf16.msra.mxu1 %v234_v4  ;;  %v190_v8 = vld [vmem:[%s324_s2] ss:$0 sm:$0xff]  ;;  %s182_s3 = sshll.u32 %s261_s9, 4  ;;  %s183_s3 = int_to_ptr.vmem [resolvable:$true] %s182_s3 }
   0x9   :  { %213 = vmatmul.mubr.msk.bf16.vlgmr.msra.gmra.mxu0 %vm46_vm1, %v22_v5  ;;  %220 = vmatprep.subr.bf16.mxu1 %v259_v1  ;;  %v194_v16 = vld [vmem:[%s326_s4] ss:$0 sm:$0xff]  ;;  %s237_s2 = scalar_lea.vmem %s183_s3, 128  ;;  %p242_p1 = scmp.lt.s32.totalorder %s183_s3, %s183_s3 }
   0xa   :  { %p238_p0 = scmp.ne.s32.totalorder %s183_s3, %s237_s2  ;;  %p243_p2 = scmp.lt.s32.totalorder %s237_s2, %s237_s2 }
   0xc   :  { %221 = vmatpush3.bf16.msra.mxu1 %v235_v6  ;;  %p244_p3 = por %p243_p2, %p242_p1 }
   0xd   :  { %222 = vmatprep.subr.bf16.mxu1 %v259_v1 }
   0xe   :  { %p245_p4 = pnand %p244_p3, %p238_p0 }
  0x10   :  { %223 = vmatpush3.bf16.msra.mxu1 %v236_v7 }
  0xc9   :  { %v84_v9 = vpop.f32.mrf.mxu0 }
  0xca   :  { %v85_v10 = vadd.f32 %v190_v8, %v84_v9 }
  0xcb   :  { %v214_v11 = vpop.f32.mrf.mxu0 }
  0xcc   :  { %v90_v12 = vmax.f32 %v85_v10, 0.0 }
  0xcd   :  { %v87_v13 = vpop.f32.mrf.mxu0 }
  0xce   :  { %v91_v14 = vpack.c.bf16 %v90_v12, %v90_v12 }
  0xcf   :  { %v215_v15 = vpop.f32.mrf.mxu0 }
  0xd0   :  { %225 = vmatmul.mubr.msk.bf16.vlgmr.msra.gmra.mxu1 %vm131_vm2, %v91_v14 }
 0x190   :  { %v169_v17 = vpop.f32.mrf.mxu1 }
 0x191   :  { %v170_v18 = vadd.f32 %v194_v16, %v169_v17 }
 0x192   :  { %v226_v19 = vpop.f32.mrf.mxu1 }
 0x193   :  { %175 = vst [vmem:[#allocation2] sm:$0xff] %v170_v18 }
 0x194   :  { %v172_v20 = vpop.f32.mrf.mxu1 }
 0x195   :  { %248 = shalt.err (!%p245_p4)
}
 0x196   :  { %185 = dma.vmem_to_hbm [thread:$0]  %s183_s3, 128, %s327_s5, [#allocation3]   ;;  %v227_v21 = vpop.f32.mrf.mxu1 }
 0x197   :  { %257 = dma.done.wait [#allocation3], 128  }
 0x198   :  { %258 = vsyncadd [#allocation3], 4294967168 }
 0x199   :  { %189 = vsyncpa [#allocation3], 1 }

</bundles_post_ra>
